<compile_context>
chip_gen: v6e
topology: v6e:2x2x1
jax: 0.10.0
libtpu: 0.0.40
codegen_flags: <defaults>
</compile_context>

<pallas_src>
import functools

import jax
import jax.numpy as jnp
from jax.experimental import pallas as pl
from jax.experimental.pallas import tpu as pltpu


def _round_up(x, m):
    return ((x + m - 1) // m) * m


def _conv_s2d_kernel(x_ref, wa_ref, wb0_ref, wb1_ref, wc_ref, wd_ref, b_ref,
                     o_ref, *, mv, pitch, cin, apply_relu):
    """One image: 3x3/s2 conv as 5 shifted matmuls over the flat 2x2-cell axis.

    x_ref : (1, Lp, 4*Cin) bf16  s2d cells, channel layout (dh, dw, c), zero tail
    wa    : (4*Cin, Cout_p)      taps (a,b) in {0,1}^2   -> cell (i, j)
    wb0   : (Cin,   Cout_p)      tap (0,2)               -> cell (i, j+1), (dh=0,dw=0)
    wb1   : (Cin,   Cout_p)      tap (1,2)               -> cell (i, j+1), (dh=1,dw=0)
    wc    : (2*Cin, Cout_p)      taps (2,0),(2,1)        -> cell (i+1, j), dh=0
    wd    : (Cin,   Cout_p)      tap (2,2)               -> cell (i+1, j+1), (0,0)
    b_ref : (1, Cout_p) f32      bias
    o_ref : (1, Mv, Cout_p) f32  output cells; doubles as the f32 accumulator
    """
    k4 = 4 * cin

    def ld(shift, c0, c1):
        # Static bf16 slice read straight from the ref (no f32 unpack, no
        # round-trip casts).  ReLU of the p7 branch is fused here, in bf16
        # (max(x, 0) is exact in bf16).
        v = x_ref[0, shift:shift + mv, c0:c1]
        return jnp.maximum(v, 0) if apply_relu else v

    def mm(x, w_ref):
        return jnp.dot(x, w_ref[...], preferred_element_type=jnp.float32)

    # f32 accumulation in the output VMEM block (no SSA temporaries).
    o_ref[0] = mm(ld(0, 0, k4), wa_ref) + b_ref[...]            # aligned tap
    o_ref[0] += mm(ld(1, 0, cin), wb0_ref)                      # +1 cell col
    o_ref[0] += mm(ld(1, 2 * cin, 3 * cin), wb1_ref)            # +1 cell col
    o_ref[0] += mm(ld(pitch, 0, 2 * cin), wc_ref)               # +1 cell row
    o_ref[0] += mm(ld(pitch + 1, 0, cin), wd_ref)               # +1 row, +1 col


def _conv3x3_s2_p1(x, w_hwio, bias, *, apply_relu, layout="NHWC",
                   compute_dtype=jnp.bfloat16, out_dtype=jnp.float32):
    """3x3 / stride-2 / pad-1 conv via space-to-depth + parity-group matmuls."""
    assert layout in ("NCHW", "NHWC")
    if layout == "NCHW":
        N, Cin, H, W = x.shape
    else:
        N, H, W, Cin = x.shape
    Cout = w_hwio.shape[-1]
    Ho = (H - 1) // 2 + 1
    Wo = (W - 1) // 2 + 1
    Hc, Wc = Ho + 1, Wo + 1            # 2x2-cell grid covering the padded input

    # Cell-row pitch: align to a sublane multiple only when the wasted
    # (discarded) padded columns stay below 1/8 of the row -- otherwise the
    # extra MXU work exceeds the XLU realign it would save.
    Wcp = _round_up(Wc, 8)
    if (Wcp - Wc) * 8 > Wc:
        Wcp = Wc

    K4 = 4 * Cin
    Mv = Hc * Wcp                      # output cells computed per image
    Lp = _round_up(Mv + Wcp + 1, 8)    # minimal zero tail for the max shift
    Cout_p = _round_up(Cout, 128)      # lane-dense output stores

    # ---- input: conv pad=1 (+ round up to whole 2x2 cells), s2d reorg.
    pad_b = 2 * Hc - (H + 1)
    pad_r = 2 * Wcp - (W + 1)
    xc = x.astype(compute_dtype)
    if layout == "NCHW":
        # Fold NCHW->NHWC into the s2d transpose: one relayout pass total.
        xp = jnp.pad(xc, ((0, 0), (0, 0), (1, pad_b), (1, pad_r)))
        xs = xp.reshape(N, Cin, Hc, 2, Wcp, 2).transpose(0, 2, 4, 3, 5, 1)
    else:
        xp = jnp.pad(xc, ((0, 0), (1, pad_b), (1, pad_r), (0, 0)))
        xs = xp.reshape(N, Hc, 2, Wcp, 2, Cin).transpose(0, 1, 3, 2, 4, 5)
    xs = xs.reshape(N, Mv, K4)                         # channel layout (dh,dw,c)
    xs = jnp.pad(xs, ((0, 0), (0, Lp - Mv), (0, 0)))   # tiny zero tail

    # ---- weights: parity groups of the 3x3 taps (no all-zero padded taps).
    pc = ((0, 0), (0, Cout_p - Cout))
    wf = w_hwio.astype(compute_dtype)
    w_a = jnp.pad(wf[0:2, 0:2].reshape(K4, Cout), pc)        # (dh,dw,c) order
    w_b0 = jnp.pad(wf[0, 2], pc)                             # tap (0,2)
    w_b1 = jnp.pad(wf[1, 2], pc)                             # tap (1,2)
    w_c = jnp.pad(wf[2, 0:2].reshape(2 * Cin, Cout), pc)     # taps (2,0),(2,1)
    w_d = jnp.pad(wf[2, 2], pc)                              # tap (2,2)
    b2 = jnp.pad(bias.astype(jnp.float32),
                 (0, Cout_p - Cout)).reshape(1, Cout_p)

    # ---- explicit VMEM budget from the actual block shapes (double-buffered
    # x/out + resident weight groups + slack), never below the default limits.
    it = jnp.dtype(compute_dtype).itemsize
    est = (2 * Lp * K4 * it                  # input block
           + 2 * 9 * Cin * Cout_p * it       # 5 weight groups (9*Cin rows total)
           + 2 * Cout_p * 4                  # bias
           + 2 * Mv * Cout_p * 4)            # f32 output block
    vmem_limit = int(min(max(1.25 * est + (2 << 20), 32 << 20), 100 << 20))

    # TODO(synk): for very large Cin (>~1024) add a K-tile grid axis (marked
    # "arbitrary", accumulating in the f32 output block), single-buffer the
    # resident weight groups (pipeline_mode=pl.Buffered(1)), and tile Mv over
    # cell-rows ("parallel") so batch-1 inputs still pipeline DMA/compute and
    # use both v7x TensorCores; not needed at these shapes.
    kernel = functools.partial(_conv_s2d_kernel, mv=Mv, pitch=Wcp, cin=Cin,
                               apply_relu=apply_relu)
    out = pl.pallas_call(
        kernel,
        out_shape=jax.ShapeDtypeStruct((N, Mv, Cout_p), out_dtype),
        grid=(N,),
        in_specs=[
            pl.BlockSpec((1, Lp, K4), lambda n: (n, 0, 0)),        # one image
            pl.BlockSpec((K4, Cout_p), lambda n: (0, 0)),          # resident W_a
            pl.BlockSpec((Cin, Cout_p), lambda n: (0, 0)),         # resident W_b0
            pl.BlockSpec((Cin, Cout_p), lambda n: (0, 0)),         # resident W_b1
            pl.BlockSpec((2 * Cin, Cout_p), lambda n: (0, 0)),     # resident W_c
            pl.BlockSpec((Cin, Cout_p), lambda n: (0, 0)),         # resident W_d
            pl.BlockSpec((1, Cout_p), lambda n: (0, 0)),           # resident bias
        ],
        out_specs=pl.BlockSpec((1, Mv, Cout_p), lambda n: (n, 0, 0)),
        compiler_params=pltpu.CompilerParams(
            dimension_semantics=("parallel",),
            vmem_limit_bytes=vmem_limit),
    )(xs, w_a, w_b0, w_b1, w_c, w_d, b2)

    # Drop the padded output row/cols and the lane padding of Cout. (NHWC out)
    return out.reshape(N, Hc, Wcp, Cout_p)[:, :Ho, :Wo, :Cout]


class LastLevelP6P7:
    """JAX/Pallas port of efg's LastLevelP6P7 (forward pass only)."""

    num_levels = 2

    def __init__(self, in_channels, out_channels, key, in_feature="res5"):
        self.in_feature = in_feature
        k1, k2, k3, k4 = jax.random.split(key, 4)
        # c2_xavier_fill == kaiming_uniform(a=1): U(-sqrt(3/fan_in), sqrt(3/fan_in))
        fan6 = in_channels * 9
        b6 = (3.0 / fan6) ** 0.5
        self.w6 = jax.random.uniform(k1, (3, 3, in_channels, out_channels),
                                     jnp.float32, -b6, b6)          # HWIO
        self.b6 = 0.01 * jax.random.normal(k2, (out_channels,), jnp.float32)
        fan7 = out_channels * 9
        b7 = (3.0 / fan7) ** 0.5
        self.w7 = jax.random.uniform(k3, (3, 3, out_channels, out_channels),
                                     jnp.float32, -b7, b7)          # HWIO
        self.b7 = 0.01 * jax.random.normal(k4, (out_channels,), jnp.float32)

    def __call__(self, x_nchw):
        # Stage 1 consumes NCHW directly (transpose folded into its s2d).
        p6 = _conv3x3_s2_p1(x_nchw, self.w6, self.b6,
                            apply_relu=False, layout="NCHW")         # NHWC
        p7 = _conv3x3_s2_p1(p6, self.w7, self.b7,
                            apply_relu=True, layout="NHWC")          # relu fused
        # Return NCHW to match the PyTorch module's output convention.
        return [jnp.transpose(p6, (0, 3, 1, 2)),
                jnp.transpose(p7, (0, 3, 1, 2))]


def _ref_conv_nchw(x, w_hwio, bias):
    y = jax.lax.conv_general_dilated(
        x, w_hwio, window_strides=(2, 2), padding=((1, 1), (1, 1)),
        dimension_numbers=("NCHW", "HWIO", "NCHW"))
    return y + bias[None, :, None, None]


def _r(a):
    """Round-trip to bf16: matches the kernel's MXU operand precision."""
    return a.astype(jnp.bfloat16).astype(jnp.float32)


if __name__ == "__main__":
    key = jax.random.PRNGKey(0)
    k_param, k_x = jax.random.split(key)

    in_channels, out_channels = 4, 8
    N, H, W = 2, 16, 16
    x = jax.random.normal(k_x, (N, in_channels, H, W), jnp.float32)

    module = LastLevelP6P7(in_channels, out_channels, k_param)
    p6, p7 = module(x)
    jax.block_until_ready((p6, p7))

    assert p6.shape == (N, out_channels, 8, 8), p6.shape
    assert p7.shape == (N, out_channels, 4, 4), p7.shape

    # Cross-check against XLA's conv on bf16-rounded operands (accumulation is
    # f32 in both paths, so only summation order differs).
    ref_p6 = _ref_conv_nchw(_r(x), _r(module.w6), module.b6)
    # p7 is checked against a reference driven by the kernel's own p6 so that
    # both sides apply identical bf16 rounding to the stage-2 input.
    ref_p7 = _ref_conv_nchw(_r(jnp.maximum(p6, 0.0)), _r(module.w7), module.b7)

    assert jnp.allclose(p6, ref_p6, atol=2e-3, rtol=2e-3), "p6 mismatch"
    assert jnp.allclose(p7, ref_p7, atol=2e-3, rtol=2e-3), "p7 mismatch"

    print("KERNEL_OK")
</pallas_src>

<mosaic_0001>
module attributes {stable_mosaic.version = 11 : i64} {
  func.func @_conv_s2d_kernel(%arg0: i32, %arg1: memref<1x96x16xbf16, #tpu.memory_space<vmem>>, %arg2: memref<16x128xbf16, #tpu.memory_space<vmem>>, %arg3: memref<4x128xbf16, #tpu.memory_space<vmem>>, %arg4: memref<4x128xbf16, #tpu.memory_space<vmem>>, %arg5: memref<8x128xbf16, #tpu.memory_space<vmem>>, %arg6: memref<4x128xbf16, #tpu.memory_space<vmem>>, %arg7: memref<1x128xf32, #tpu.memory_space<vmem>>, %arg8: memref<1x81x128xf32, #tpu.memory_space<vmem>>) attributes {dimension_semantics = [#tpu.dimension_semantics<parallel>], iteration_bounds = array<i64: 2>, scalar_prefetch = 0 : i64, scratch_operands = 0 : i64, tpu.core_type = #tpu.core_type<tc>, window_params = [{transform_indices = @transform_0, window_bounds = array<i64: 1, 96, 16>}, {pipeline_mode = #tpu.pipeline_mode<synchronous>, transform_indices = @transform_1, window_bounds = array<i64: 16, 128>}, {pipeline_mode = #tpu.pipeline_mode<synchronous>, transform_indices = @transform_2, window_bounds = array<i64: 4, 128>}, {pipeline_mode = #tpu.pipeline_mode<synchronous>, transform_indices = @transform_3, window_bounds = array<i64: 4, 128>}, {pipeline_mode = #tpu.pipeline_mode<synchronous>, transform_indices = @transform_4, window_bounds = array<i64: 8, 128>}, {pipeline_mode = #tpu.pipeline_mode<synchronous>, transform_indices = @transform_5, window_bounds = array<i64: 4, 128>}, {pipeline_mode = #tpu.pipeline_mode<synchronous>, transform_indices = @transform_6, window_bounds = array<i64: 1, 128>}, {transform_indices = @transform_7, window_bounds = array<i64: 1, 81, 128>}]} {
    %c0 = arith.constant 0 : index
    %c0_0 = arith.constant 0 : index
    %c0_1 = arith.constant 0 : index
    %0 = vector.load %arg1[%c0, %c0_0, %c0_1] : memref<1x96x16xbf16, #tpu.memory_space<vmem>>, vector<1x81x16xbf16>
    %1 = vector.shape_cast %0 : vector<1x81x16xbf16> to vector<81x16xbf16>
    %c0_2 = arith.constant 0 : index
    %c0_3 = arith.constant 0 : index
    %2 = vector.load %arg2[%c0_2, %c0_3] : memref<16x128xbf16, #tpu.memory_space<vmem>>, vector<16x128xbf16>
    %cst = arith.constant dense<0.000000e+00> : vector<81x128xf32>
    %3 = tpu.matmul %1, %2, %cst {dimension_numbers = #tpu.dot_dimension_numbers<[1], [0], [0], [1], [0, 0, 1, 1], [], []>} : vector<81x16xbf16>, vector<16x128xbf16>, vector<81x128xf32> -> vector<81x128xf32>
    %c0_4 = arith.constant 0 : index
    %c0_5 = arith.constant 0 : index
    %4 = vector.load %arg7[%c0_4, %c0_5] : memref<1x128xf32, #tpu.memory_space<vmem>>, vector<1x128xf32>
    %5 = vector.broadcast %4 : vector<1x128xf32> to vector<81x128xf32>
    %6 = arith.addf %3, %5 : vector<81x128xf32>
    %c0_6 = arith.constant 0 : index
    %c0_7 = arith.constant 0 : index
    %c0_8 = arith.constant 0 : index
    %7 = vector.load %arg8[%c0_6, %c0_7, %c0_8] : memref<1x81x128xf32, #tpu.memory_space<vmem>>, vector<1x81x128xf32>
    %8 = vector.shape_cast %7 : vector<1x81x128xf32> to vector<81x128xf32>
    %9 = vector.shape_cast %6 : vector<81x128xf32> to vector<1x81x128xf32>
    tpu.vector_store %arg8[%c0_6, %c0_7, %c0_8], %9 {strides = array<i32>} : memref<1x81x128xf32, #tpu.memory_space<vmem>>, vector<1x81x128xf32>,
    %c0_9 = arith.constant 0 : index
    %c0_10 = arith.constant 0 : index
    %c0_11 = arith.constant 0 : index
    %10 = vector.load %arg8[%c0_9, %c0_10, %c0_11] : memref<1x81x128xf32, #tpu.memory_space<vmem>>, vector<1x81x128xf32>
    %11 = vector.shape_cast %10 : vector<1x81x128xf32> to vector<81x128xf32>
    %c0_12 = arith.constant 0 : index
    %c1 = arith.constant 1 : index
    %c0_13 = arith.constant 0 : index
    %12 = vector.load %arg1[%c0_12, %c1, %c0_13] : memref<1x96x16xbf16, #tpu.memory_space<vmem>>, vector<1x81x4xbf16>
    %13 = vector.shape_cast %12 : vector<1x81x4xbf16> to vector<81x4xbf16>
    %c0_14 = arith.constant 0 : index
    %c0_15 = arith.constant 0 : index
    %14 = vector.load %arg3[%c0_14, %c0_15] : memref<4x128xbf16, #tpu.memory_space<vmem>>, vector<4x128xbf16>
    %cst_16 = arith.constant dense<0.000000e+00> : vector<81x128xf32>
    %15 = tpu.matmul %13, %14, %cst_16 {dimension_numbers = #tpu.dot_dimension_numbers<[1], [0], [0], [1], [0, 0, 1, 1], [], []>} : vector<81x4xbf16>, vector<4x128xbf16>, vector<81x128xf32> -> vector<81x128xf32>
    %16 = arith.addf %11, %15 : vector<81x128xf32>
    %c0_17 = arith.constant 0 : index
    %c0_18 = arith.constant 0 : index
    %c0_19 = arith.constant 0 : index
    %17 = vector.load %arg8[%c0_17, %c0_18, %c0_19] : memref<1x81x128xf32, #tpu.memory_space<vmem>>, vector<1x81x128xf32>
    %18 = vector.shape_cast %17 : vector<1x81x128xf32> to vector<81x128xf32>
    %19 = vector.shape_cast %16 : vector<81x128xf32> to vector<1x81x128xf32>
    tpu.vector_store %arg8[%c0_17, %c0_18, %c0_19], %19 {strides = array<i32>} : memref<1x81x128xf32, #tpu.memory_space<vmem>>, vector<1x81x128xf32>,
    %c0_20 = arith.constant 0 : index
    %c0_21 = arith.constant 0 : index
    %c0_22 = arith.constant 0 : index
    %20 = vector.load %arg8[%c0_20, %c0_21, %c0_22] : memref<1x81x128xf32, #tpu.memory_space<vmem>>, vector<1x81x128xf32>
    %21 = vector.shape_cast %20 : vector<1x81x128xf32> to vector<81x128xf32>
    %c0_23 = arith.constant 0 : index
    %c1_24 = arith.constant 1 : index
    %c8 = arith.constant 8 : index
    %22 = vector.load %arg1[%c0_23, %c1_24, %c8] : memref<1x96x16xbf16, #tpu.memory_space<vmem>>, vector<1x81x4xbf16>
    %23 = vector.shape_cast %22 : vector<1x81x4xbf16> to vector<81x4xbf16>
    %c0_25 = arith.constant 0 : index
    %c0_26 = arith.constant 0 : index
    %24 = vector.load %arg4[%c0_25, %c0_26] : memref<4x128xbf16, #tpu.memory_space<vmem>>, vector<4x128xbf16>
    %cst_27 = arith.constant dense<0.000000e+00> : vector<81x128xf32>
    %25 = tpu.matmul %23, %24, %cst_27 {dimension_numbers = #tpu.dot_dimension_numbers<[1], [0], [0], [1], [0, 0, 1, 1], [], []>} : vector<81x4xbf16>, vector<4x128xbf16>, vector<81x128xf32> -> vector<81x128xf32>
    %26 = arith.addf %21, %25 : vector<81x128xf32>
    %c0_28 = arith.constant 0 : index
    %c0_29 = arith.constant 0 : index
    %c0_30 = arith.constant 0 : index
    %27 = vector.load %arg8[%c0_28, %c0_29, %c0_30] : memref<1x81x128xf32, #tpu.memory_space<vmem>>, vector<1x81x128xf32>
    %28 = vector.shape_cast %27 : vector<1x81x128xf32> to vector<81x128xf32>
    %29 = vector.shape_cast %26 : vector<81x128xf32> to vector<1x81x128xf32>
    tpu.vector_store %arg8[%c0_28, %c0_29, %c0_30], %29 {strides = array<i32>} : memref<1x81x128xf32, #tpu.memory_space<vmem>>, vector<1x81x128xf32>,
    %c0_31 = arith.constant 0 : index
    %c0_32 = arith.constant 0 : index
    %c0_33 = arith.constant 0 : index
    %30 = vector.load %arg8[%c0_31, %c0_32, %c0_33] : memref<1x81x128xf32, #tpu.memory_space<vmem>>, vector<1x81x128xf32>
    %31 = vector.shape_cast %30 : vector<1x81x128xf32> to vector<81x128xf32>
    %c0_34 = arith.constant 0 : index
    %c9 = arith.constant 9 : index
    %c0_35 = arith.constant 0 : index
    %32 = vector.load %arg1[%c0_34, %c9, %c0_35] : memref<1x96x16xbf16, #tpu.memory_space<vmem>>, vector<1x81x8xbf16>
    %33 = vector.shape_cast %32 : vector<1x81x8xbf16> to vector<81x8xbf16>
    %c0_36 = arith.constant 0 : index
    %c0_37 = arith.constant 0 : index
    %34 = vector.load %arg5[%c0_36, %c0_37] : memref<8x128xbf16, #tpu.memory_space<vmem>>, vector<8x128xbf16>
    %cst_38 = arith.constant dense<0.000000e+00> : vector<81x128xf32>
    %35 = tpu.matmul %33, %34, %cst_38 {dimension_numbers = #tpu.dot_dimension_numbers<[1], [0], [0], [1], [0, 0, 1, 1], [], []>} : vector<81x8xbf16>, vector<8x128xbf16>, vector<81x128xf32> -> vector<81x128xf32>
    %36 = arith.addf %31, %35 : vector<81x128xf32>
    %c0_39 = arith.constant 0 : index
    %c0_40 = arith.constant 0 : index
    %c0_41 = arith.constant 0 : index
    %37 = vector.load %arg8[%c0_39, %c0_40, %c0_41] : memref<1x81x128xf32, #tpu.memory_space<vmem>>, vector<1x81x128xf32>
    %38 = vector.shape_cast %37 : vector<1x81x128xf32> to vector<81x128xf32>
    %39 = vector.shape_cast %36 : vector<81x128xf32> to vector<1x81x128xf32>
    tpu.vector_store %arg8[%c0_39, %c0_40, %c0_41], %39 {strides = array<i32>} : memref<1x81x128xf32, #tpu.memory_space<vmem>>, vector<1x81x128xf32>,
    %c0_42 = arith.constant 0 : index
    %c0_43 = arith.constant 0 : index
    %c0_44 = arith.constant 0 : index
    %40 = vector.load %arg8[%c0_42, %c0_43, %c0_44] : memref<1x81x128xf32, #tpu.memory_space<vmem>>, vector<1x81x128xf32>
    %41 = vector.shape_cast %40 : vector<1x81x128xf32> to vector<81x128xf32>
    %c0_45 = arith.constant 0 : index
    %c10 = arith.constant 10 : index
    %c0_46 = arith.constant 0 : index
    %42 = vector.load %arg1[%c0_45, %c10, %c0_46] : memref<1x96x16xbf16, #tpu.memory_space<vmem>>, vector<1x81x4xbf16>
    %43 = vector.shape_cast %42 : vector<1x81x4xbf16> to vector<81x4xbf16>
    %c0_47 = arith.constant 0 : index
    %c0_48 = arith.constant 0 : index
    %44 = vector.load %arg6[%c0_47, %c0_48] : memref<4x128xbf16, #tpu.memory_space<vmem>>, vector<4x128xbf16>
    %cst_49 = arith.constant dense<0.000000e+00> : vector<81x128xf32>
    %45 = tpu.matmul %43, %44, %cst_49 {dimension_numbers = #tpu.dot_dimension_numbers<[1], [0], [0], [1], [0, 0, 1, 1], [], []>} : vector<81x4xbf16>, vector<4x128xbf16>, vector<81x128xf32> -> vector<81x128xf32>
    %46 = arith.addf %41, %45 : vector<81x128xf32>
    %c0_50 = arith.constant 0 : index
    %c0_51 = arith.constant 0 : index
    %c0_52 = arith.constant 0 : index
    %47 = vector.load %arg8[%c0_50, %c0_51, %c0_52] : memref<1x81x128xf32, #tpu.memory_space<vmem>>, vector<1x81x128xf32>
    %48 = vector.shape_cast %47 : vector<1x81x128xf32> to vector<81x128xf32>
    %49 = vector.shape_cast %46 : vector<81x128xf32> to vector<1x81x128xf32>
    tpu.vector_store %arg8[%c0_50, %c0_51, %c0_52], %49 {strides = array<i32>} : memref<1x81x128xf32, #tpu.memory_space<vmem>>, vector<1x81x128xf32>,
    return
  }
  func.func @transform_0(%arg0: i32) -> (i32, i32, i32) {
    %c0_i32 = arith.constant 0 : i32
    %c0_i32_0 = arith.constant 0 : i32
    %c0_i32_1 = arith.constant 0 : i32
    return %arg0, %c0_i32, %c0_i32_0 : i32, i32, i32
  }
  func.func @transform_1(%arg0: i32) -> (i32, i32) {
    %c0_i32 = arith.constant 0 : i32
    %c0_i32_0 = arith.constant 0 : i32
    %c0_i32_1 = arith.constant 0 : i32
    return %c0_i32, %c0_i32_0 : i32, i32
  }
  func.func @transform_2(%arg0: i32) -> (i32, i32) {
    %c0_i32 = arith.constant 0 : i32
    %c0_i32_0 = arith.constant 0 : i32
    %c0_i32_1 = arith.constant 0 : i32
    return %c0_i32, %c0_i32_0 : i32, i32
  }
  func.func @transform_3(%arg0: i32) -> (i32, i32) {
    %c0_i32 = arith.constant 0 : i32
    %c0_i32_0 = arith.constant 0 : i32
    %c0_i32_1 = arith.constant 0 : i32
    return %c0_i32, %c0_i32_0 : i32, i32
  }
  func.func @transform_4(%arg0: i32) -> (i32, i32) {
    %c0_i32 = arith.constant 0 : i32
    %c0_i32_0 = arith.constant 0 : i32
    %c0_i32_1 = arith.constant 0 : i32
    return %c0_i32, %c0_i32_0 : i32, i32
  }
  func.func @transform_5(%arg0: i32) -> (i32, i32) {
    %c0_i32 = arith.constant 0 : i32
    %c0_i32_0 = arith.constant 0 : i32
    %c0_i32_1 = arith.constant 0 : i32
    return %c0_i32, %c0_i32_0 : i32, i32
  }
  func.func @transform_6(%arg0: i32) -> (i32, i32) {
    %c0_i32 = arith.constant 0 : i32
    %c0_i32_0 = arith.constant 0 : i32
    %c0_i32_1 = arith.constant 0 : i32
    return %c0_i32, %c0_i32_0 : i32, i32
  }
  func.func @transform_7(%arg0: i32) -> (i32, i32, i32) {
    %c0_i32 = arith.constant 0 : i32
    %c0_i32_0 = arith.constant 0 : i32
    %c0_i32_1 = arith.constant 0 : i32
    return %arg0, %c0_i32, %c0_i32_0 : i32, i32, i32
  }
}

</mosaic_0001>

<bundles_post_ra>
// kernel: tpu_custom_call.1
= control target key start
LH: loop header
LB: loop body
LE: loop exit
PB: predicated region body
PF: predicated region fallthrough
CT: control target
= control target key end

     0   :  { %s1635_s24 = smov 0   ;;  %s1807_s0 = inlined_call_operand.vmem [shape: bf16[2,96,16], index: 0, kind: input, shape index: {}]   ;;  %s1808_s1 = inlined_call_operand.vmem [shape: bf16[16,128], index: 1, kind: input, shape index: {}]   ;;  %s1809_s2 = inlined_call_operand.vmem [shape: bf16[4,128], index: 2, kind: input, shape index: {}]   ;;  %s1810_s3 = inlined_call_operand.vmem [shape: bf16[4,128], index: 3, kind: input, shape index: {}]   ;;  %s1811_s4 = inlined_call_operand.vmem [shape: bf16[8,128], index: 4, kind: input, shape index: {}]   ;;  %s1812_s5 = inlined_call_operand.vmem [shape: bf16[4,128], index: 5, kind: input, shape index: {}]   ;;  %s1813_s6 = inlined_call_operand.vmem [shape: f32[1,128], index: 6, kind: input, shape index: {}]   ;;  %s1814_s7 = inlined_call_operand.vmem [shape: f32[2,81,128], index: 7, kind: output, shape index: {}]  }
   0x1 LB: > { %s1362_s25 = sadd.s32 4294967295, %s1592_s24   ;;  %p1366_p0 = scmp.ge.s32.totalorder %s1592_s24, 1  ;;  %s1592_s24 = sphi %s1635_s24, %s17_s24  }
   0x2   : > { %p237_p1 = scmp.lt.s32.totalorder %s1592_s24, 3 }
   0x4   : > { %p238_p2 = pnand %p1366_p0, %p237_p1 }
   0x5   : > { %p269_p3 = scmp.lt.s32.totalorder (!%p238_p2), %s1362_s25, 1  ;;  %s1594_s15 = smov (!%p238_p2), 120  }
   0x6   : > { %241 = sbr.rel (%p238_p2) target bundleno = 384 (0x180), region = 48 }
   0xb   : > { %v1561_v0 = vld [vmem:[%s1808_s1] sm:$0xff]   ;;  %s1816_s25 = smov (!%p269_p3, %s1362_s25), 1  ;;  %vm561_vm0 = vcmask 1041408   ;;  %vm495_vm1 = vsmask.f32 7424  ;;  %vm334_vm2 = vcmask 130048  }
   0xc   : > { %v466_v1 = vld [vmem:[%s1809_s2] sm:$0x3]  ;;  %1538 = vmatprep.subr.bf16.mxu1 %v1561_v0  ;;  %1468 = vmatprep.subr.bf16.mxu0 %v1561_v0  ;;  %s1544_s9 = smul.u32 48, %s1816_s25  ;;  %vm1015_vm3 = vcmask 1043456   ;;  %vm542_vm4 = vcmask 31744   ;;  %vm996_vm5 = vcmask 64512  }
   0xd   : > { %v689_v2 = vld [vmem:[%s1810_s3] sm:$0x3]  ;;  %1539 = vmatpush3.bf16.msra.mxu1 %v1561_v0  ;;  %1469 = vmatpush3.bf16.msra.mxu0 %v1561_v0  ;;  %v563_v32 = vsel %vm561_vm0, %v466_v1, 0  ;;  %vm1172_vm6 = vcmask 1046528   ;;  %s1545_s20 = smul.u32 88, %s1816_s25 }
   0xe   : > { %1540 = vmatprep.subr.msk.bf16.mxu1 %vm561_vm0, %v466_v1  ;;  %1541 = vmatprep.subr.msk.bf16.mxu0 %vm561_vm0, %v689_v2  ;;  %s1660_s12 = scalar_lea.vmem %s1807_s0, %s1544_s9  ;;  %v1673_v29 = vld [vmem:[%s1811_s4] sm:$0xf]  ;;  %v795_v43 = vsel %vm561_vm0, %v689_v2, 0 }
   0xf   : > { %v1555_v3 = vld [vmem:[%s1660_s12] sm:$0xff]   ;;  %v1556_v4 = vld [vmem:[%s1660_s12 + $0x8] sm:$0xff]   ;;  %v1557_v5 = vld [vmem:[%s1660_s12 + $0x10] sm:$0xff]   ;;  %s1774_s23 = scalar_lea.vmem %s1814_s7, %s1545_s20 }
  0x10   : > { %v719_v6 = vshrl.u32 %v1555_v3, 16  ;;  %v721_v7 = vshll.u32 %v1555_v3, 16  ;;  %v726_v8 = vshll.u32 %v1556_v4, 16  ;;  %v730_v9 = vshrl.u32 %v1556_v4, 16  ;;  %v1558_v11 = vld [vmem:[%s1660_s12 + $0x18] sm:$0xff]   ;;  %v1559_v13 = vld [vmem:[%s1660_s12 + $0x20] sm:$0xff]  }
  0x11   : > { %v734_v10 = vshll.u32 %v1557_v5, 16  ;;  %v738_v12 = vshrl.u32 %v1557_v5, 16  ;;  %v742_v17 = vshll.u32 %v1558_v11, 16  ;;  %v746_v18 = vshrl.u32 %v1558_v11, 16  ;;  %v1562_v27 = vld [vmem:[%s1660_s12 + $0x10] sm:$0xff]   ;;  %v1563_v28 = vld [vmem:[%s1660_s12 + $0x18] sm:$0xff]  }
  0x12   : > { %v723_v14 = vrot.slane %v721_v7, 1  ;;  %v728_v15 = vrot.slane %v726_v8, 1  ;;  %v750_v19 = vshll.u32 %v1559_v13, 16  ;;  %v1560_v22 = vld [vmem:[%s1660_s12 + $0x28] ss:$0 sps:$4 sm:$0x11]   ;;  %1474 = vmatprep.mubr.msk.bf16.mxu1 %vm334_vm2, %v1562_v27 }
  0x13   : > { %v736_v16 = vrot.slane %v734_v10, 1  ;;  %v754_v23 = vshrl.u32 %v1559_v13, 16  ;;  %v744_v25 = vrot.slane %v742_v17, 1  ;;  %v758_v31 = vshll.u32 %v1560_v22, 16  ;;  %v1564_v36 = vld [vmem:[%s1660_s12 + $0x20] sm:$0xff]   ;;  %1475 = vmatmul.mubr.msk.bf16.vlgmr.msra.gmra.mxu1 %vm334_vm2, %v1563_v28  ;;  %v1567_v42 = vld [vmem:[%s1660_s12 + $0x8] sm:$0xff]  }
  0x14   : > { %v724_v20 = vor.u32 %v723_v14, %v719_v6  ;;  %v732_v21 = vor.u32 %v730_v9, %v728_v15  ;;  %v752_v26 = vrot.slane %v750_v19, 1  ;;  %1478 = vmatprep.mubr.msk.bf16.mxu1 %vm334_vm2, %v1564_v36  ;;  %1483 = vmatpush3.bf16.msra.mxu1 %v563_v32  ;;  %v1565_v40 = vld [vmem:[%s1660_s12 + $0x28] ss:$0 sps:$4 sm:$0x11]   ;;  %v1566_v41 = vld [vmem:[%s1660_s12] sm:$0xff]   ;;  %v762_v45 = vshrl.u32 %v1560_v22, 16 }
  0x15   : > { %v740_v24 = vor.u32 %v738_v12, %v736_v16  ;;  %v748_v34 = vor.u32 %v746_v18, %v744_v25  ;;  %v760_v38 = vrot.slane %v758_v31, 1  ;;  %1542 = vmatprep.subr.msk.bf16.mxu1 %vm1015_vm3, %v1673_v29  ;;  %v1568_v46 = vld [vmem:[%s1660_s12 + $0x10] sm:$0xff]   ;;  %v497_v47 = vshrl.u32 %v1566_v41, 16  ;;  %v1569_v52 = vld [vmem:[%s1660_s12] sm:$0xff]   ;;  %v1570_v55 = vld [vmem:[%s1660_s12 + $0x8] sm:$0xff]  }
  0x16   : > { %v729_v30 = vsel %vm495_vm1, %v724_v20, %v728_v15  ;;  %v756_v35 = vor.u32 %v754_v23, %v752_v26  ;;  %v737_v37 = vsel %vm495_vm1, %v732_v21, %v736_v16  ;;  %v499_v48 = vshll.u32 %v1566_v41, 16  ;;  %v1571_v56 = vld [vmem:[%s1660_s12 + $0x18] sm:$0xff]   ;;  %1470 = vmatprep.mubr.msk.bf16.mxu0 %vm334_vm2, %v1569_v52  ;;  %v1572_v61 = vld [vmem:[%s1660_s12 + $0x20] sm:$0xff]   ;;  %v1573_v63 = vld [vmem:[%s1660_s12 + $0x28] ss:$0 sps:$4 sm:$0x11]  }
  0x17   : > { %764 = vrot.lane.b32.xlu0 %v729_v30, %s1594_s15  ;;  %v745_v33 = vsel %vm495_vm1, %v740_v24, %v744_v25  ;;  %v753_v39 = vsel %vm495_vm1, %v748_v34, %v752_v26  ;;  %v504_v49 = vshll.u32 %v1567_v42, 16  ;;  %v508_v50 = vshrl.u32 %v1567_v42, 16  ;;  %1471 = vmatmul.mubr.msk.bf16.vlgmr.msra.gmra.mxu0 %vm334_vm2, %v1570_v55  ;;  %v1143_v3 = vld [vmem:[%s1812_s5] sm:$0x3]  ;;  %v1574_v12 = vld [vmem:[%s1660_s12 + $0x4] sm:$0xff]   ;;  %v1575_v17 = vld [vmem:[%s1660_s12 + $0xc] sm:$0xff]  }
  0x18   : > { %768 = vrot.lane.b32.xlu1 %v745_v33, %s1594_s15  ;;  %v761_v44 = vsel %vm495_vm1, %v756_v35, %v760_v38  ;;  %v512_v51 = vshll.u32 %v1568_v46, 16  ;;  %v501_v53 = vrot.slane %v499_v48, 1  ;;  %v516_v58 = vshrl.u32 %v1568_v46, 16  ;;  %1497 = vmatpush3.bf16.msra.mxu0 %v795_v43  ;;  %v1576_v24 = vld [vmem:[%s1660_s12 + $0x14] sm:$0xff]   ;;  %v1577_v27 = vld [vmem:[%s1660_s12 + $0x1c] sm:$0xff]   ;;  %v1578_v35 = vld [vmem:[%s1660_s12 + $0x24] sm:$0xff]  }
  0x19   : > { %v506_v54 = vrot.slane %v504_v49, 1  ;;  %v520_v60 = vshll.u32 %v1571_v56, 16  ;;  %1543 = vmatprep.subr.msk.bf16.mxu0 %vm561_vm0, %v1143_v3  ;;  %v1713_v4 = vsel %vm561_vm0, %v1143_v3, 0  ;;  %v528_v5 = vshll.u32 %v1572_v61, 16 }
  0x1a   : > { %v514_v57 = vrot.slane %v512_v51, 1  ;;  %v502_v59 = vor.u32 %v501_v53, %v497_v47  ;;  %v524_v7 = vshrl.u32 %v1571_v56, 16  ;;  %v532_v9 = vshrl.u32 %v1572_v61, 16 }
  0x1b   : > { %766 = vrot.lane.b32.xlu0 %v737_v37, %s1594_s15  ;;  %1479 = vmatmul.mubr.msk.bf16.gmra.mxu1 %vm334_vm2, %v1565_v40  ;;  %v510_v62 = vor.u32 %v508_v50, %v506_v54  ;;  %v522_v2 = vrot.slane %v520_v60, 1  ;;  %v536_v10 = vshll.u32 %v1573_v63, 16  ;;  %v1017_v11 = vsel %vm1015_vm3, %v1673_v29, 0 }
  0x1c   : > { %770 = vrot.lane.b32.xlu1 %v753_v39, %s1594_s15  ;;  %v507_v0 = vsel %vm495_vm1, %v502_v59, %v506_v54  ;;  %v518_v1 = vor.u32 %v516_v58, %v514_v57  ;;  %v530_v13 = vrot.slane %v528_v5, 1  ;;  %v953_v18 = vshll.u32 %v1574_v12, 16  ;;  %v1579_v39 = vld [vmem:[%s1660_s12 + $0x2c] ss:$0 sps:$4 sm:$0x11]   ;;  %v1584_v5 = vld [vmem:[%s1660_s12 + $0x24] sm:$0xff]  }
  0x1d   : > { %1484 = vmatprep.mubr.msk.bf16.mxu1 %vm542_vm4, %v507_v0  ;;  %v515_v6 = vsel %vm495_vm1, %v510_v62, %v514_v57  ;;  %v526_v14 = vor.u32 %v524_v7, %v522_v2  ;;  %v538_v16 = vrot.slane %v536_v10, 1  ;;  %v951_v20 = vshrl.u32 %v1574_v12, 16  ;;  %v1580_v58 = vld [vmem:[%s1660_s12 + $0x4] sm:$0xfe]   ;;  %v1581_v59 = vld [vmem:[%s1660_s12 + $0xc] sm:$0xff]  }
  0x1e   : > { %v523_v8 = vsel %vm495_vm1, %v518_v1, %v522_v2  ;;  %v534_v15 = vor.u32 %v532_v9, %v530_v13  ;;  %v955_v22 = vrot.slane %v953_v18, 1  ;;  %v958_v23 = vshll.u32 %v1575_v17, 16  ;;  %v1583_v1 = vld [vmem:[%s1660_s12 + $0x1c] sm:$0xff]   ;;  %v1585_v7 = vld [vmem:[%s1660_s12 + $0x2c] ss:$0 sps:$4 sm:$0x33]  }
  0x1f   : > { %772 = vrot.lane.b32.xlu0 %v761_v44, %s1594_s15  ;;  %v531_v19 = vsel %vm495_vm1, %v526_v14, %v530_v13  ;;  %v540_v28 = vshrl.u32 %v1573_v63, 16  ;;  %v966_v29 = vshll.u32 %v1576_v24, 16  ;;  %v962_v30 = vshrl.u32 %v1575_v17, 16  ;;  %v1582_v63 = vld [vmem:[%s1660_s12 + $0x14] sm:$0xff]   ;;  %v1369_v12 = vld [vmem:[%s1813_s6] ss:$0 sm:$0xff] }
  0x20   : > { %774 = vrot.lane.b32.xlu1 %v762_v45, %s1594_s15  ;;  %v539_v21 = vsel %vm495_vm1, %v534_v15, %v538_v16  ;;  %v956_v25 = vor.u32 %v955_v22, %v951_v20  ;;  %v960_v26 = vrot.slane %v958_v23, 1  ;;  %v970_v32 = vshrl.u32 %v1576_v24, 16 }
  0x21   : > { %v974_v33 = vshll.u32 %v1577_v27, 16  ;;  %v968_v34 = vrot.slane %v966_v29, 1  ;;  %v982_v40 = vshll.u32 %v1578_v35, 16  ;;  %v978_v42 = vshrl.u32 %v1577_v27, 16 }
  0x22   : > { %v961_v31 = vsel %vm495_vm1, %v956_v25, %v960_v26  ;;  %v964_v36 = vor.u32 %v962_v30, %v960_v26  ;;  %v986_v44 = vshrl.u32 %v1578_v35, 16  ;;  %v990_v45 = vshll.u32 %v1579_v39, 16 }
  0x23   : > { %1485 = vmatmul.mubr.msk.bf16.vlgmr.msra.gmra.mxu1 %vm542_vm4, %v515_v6  ;;  %v972_v37 = vor.u32 %v970_v32, %v968_v34  ;;  %v976_v38 = vrot.slane %v974_v33, 1  ;;  %v984_v46 = vrot.slane %v982_v40, 1  ;;  %v994_v52 = vshrl.u32 %v1579_v39, 16 }
  0x24   : > { %1488 = vmatprep.mubr.msk.bf16.mxu1 %vm542_vm4, %v523_v8  ;;  %1511 = vmatpush3.bf16.msra.mxu1 %v1017_v11  ;;  %v969_v41 = vsel %vm495_vm1, %v964_v36, %v968_v34  ;;  %v992_v49 = vrot.slane %v990_v45, 1  ;;  %v1173_v60 = vrot.slane %v1580_v58, 1  ;;  %v1174_v61 = vrot.slane %v1581_v59, 1 }
  0x25   : > { %v977_v43 = vsel %vm495_vm1, %v972_v37, %v976_v38  ;;  %v980_v47 = vor.u32 %v978_v42, %v976_v38  ;;  %v988_v48 = vor.u32 %v986_v44, %v984_v46  ;;  %v1176_v2 = vrot.slane %v1582_v63, 1 }
  0x26   : > { %v1175_v0 = vsel %vm1172_vm6, %v1173_v60, %v1174_v61  ;;  %v1178_v3 = vrot.slane %v1583_v1, 1  ;;  %v1180_v8 = vrot.slane %v1584_v5, 1  ;;  %v1182_v9 = vrot.slane %v1585_v7, 1 }
  0x27   : > { %v985_v50 = vsel %vm495_vm1, %v980_v47, %v984_v46  ;;  %v993_v51 = vsel %vm495_vm1, %v988_v48, %v992_v49 }
  0x28   : > { %v1179_v6 = vsel %vm1172_vm6, %v1176_v2, %v1178_v3  ;;  %v1181_v10 = vsel %vm1172_vm6, %v1178_v3, %v1180_v8  ;;  %v1183_v11 = vsel %vm1172_vm6, %v1180_v8, %v1182_v9 }
  0x2b   : > { %1489 = vmatmul.mubr.msk.bf16.gmra.mxu1 %vm542_vm4, %v531_v19 }
  0x2c   : > { %1492 = vmatprep.mubr.msk.bf16.mxu1 %vm542_vm4, %v539_v21 }
  0x33   : > { %1493 = vmatmul.mubr.msk.bf16.gmra.mxu1 %vm542_vm4, %v540_v28 }
  0x34   : > { %1512 = vmatprep.mubr.msk.bf16.mxu1 %vm996_vm5, %v961_v31 }
  0x3b   : > { %1513 = vmatmul.mubr.msk.bf16.vlgmr.msra.gmra.mxu1 %vm996_vm5, %v969_v41 }
  0x3c   : > { %1516 = vmatprep.mubr.msk.bf16.mxu1 %vm996_vm5, %v977_v43 }
  0x43   : > { %1517 = vmatmul.mubr.msk.bf16.gmra.mxu1 %vm996_vm5, %v985_v50 }
  0x44   : > { %1520 = vmatprep.mubr.msk.bf16.mxu1 %vm996_vm5, %v993_v51 }
  0x4b   : > { %1521 = vmatmul.mubr.msk.bf16.gmra.mxu1 %vm996_vm5, %v994_v52 }
  0x89   : > { %v765_v53 = vpop.permute.xlu0 %764 }
  0x8a   : > { %1498 = vmatprep.mubr.msk.bf16.mxu0 %vm542_vm4, %v765_v53  ;;  %v769_v54 = vpop.permute.xlu1 %768 }
  0x8d   : > { %v767_v55 = vpop.permute.xlu0 %766 }
  0x8e   : > { %1499 = vmatmul.mubr.msk.bf16.vlgmr.msra.gmra.mxu0 %vm542_vm4, %v767_v55  ;;  %v771_v56 = vpop.permute.xlu1 %770 }
  0x8f   : > { %1525 = vmatpush3.bf16.msra.mxu0 %v1713_v4  ;;  %1502 = vmatprep.mubr.msk.bf16.mxu0 %vm542_vm4, %v769_v54  ;;  %v1177_v4 = vsel %vm1172_vm6, %v1174_v61, %v1176_v2 }
  0x91   : > { %v773_v57 = vpop.permute.xlu0 %772 }
  0x92   : > { %v775_v62 = vpop.permute.xlu1 %774 }
  0x96   : > { %1503 = vmatmul.mubr.msk.bf16.gmra.mxu0 %vm542_vm4, %v771_v56 }
  0x97   : > { %1506 = vmatprep.mubr.msk.bf16.mxu0 %vm542_vm4, %v773_v57 }
  0x9e   : > { %1507 = vmatmul.mubr.msk.bf16.gmra.mxu0 %vm542_vm4, %v775_v62 }
  0x9f   : > { %1526 = vmatprep.mubr.msk.bf16.mxu0 %vm542_vm4, %v1175_v0 }
  0xa6   : > { %1527 = vmatmul.mubr.msk.bf16.vlgmr.msra.gmra.mxu0 %vm542_vm4, %v1177_v4 }
  0xa7   : > { %1530 = vmatprep.mubr.msk.bf16.mxu0 %vm542_vm4, %v1179_v6 }
  0xae   : > { %1531 = vmatmul.mubr.msk.bf16.gmra.mxu0 %vm542_vm4, %v1181_v10 }
  0xaf   : > { %1534 = vmatprep.mubr.msk.bf16.mxu0 %vm542_vm4, %v1183_v11 }
  0xb6   : > { %1535 = vmatmul.mubr.msk.bf16.gmra.mxu0 %vm542_vm4, %v1182_v9 }
  0xd3   : > { %v1476_v13 = vpop.f32.mrf.mxu1 }
  0xd4   : > { %v412_v14 = vadd.f32 %v1476_v13, %v1369_v12 }
  0xd5   : > { %v403_v15 = vpop.f32.mrf.mxu1 }
  0xd6   : > { %v404_v16 = vadd.f32 %v1369_v12, %v403_v15 }
  0xd7   : > { %v1477_v17 = vpop.f32.mrf.mxu1  ;;  %v1472_v23 = vpop.f32.mrf.mxu0 }
  0xd8   : > { %v415_v18 = vadd.f32 %v1477_v17, %v1369_v12  ;;  %v396_v28 = vadd.f32 %v1472_v23, %v1369_v12 }
  0xd9   : > { %v406_v19 = vpop.f32.mrf.mxu1  ;;  %v387_v26 = vpop.f32.mrf.mxu0 }
  0xda   : > { %v407_v20 = vadd.f32 %v1369_v12, %v406_v19  ;;  %v388_v32 = vadd.f32 %v1369_v12, %v387_v26 }
  0xdb   : > { %v1480_v21 = vpop.f32.mrf.mxu1  ;;  %v1473_v29 = vpop.f32.mrf.mxu0 }
  0xdc   : > { %v428_v22 = vadd.f32 %v1480_v21, %v1369_v12  ;;  %v399_v36 = vadd.f32 %v1473_v29, %v1369_v12 }
  0xdd   : > { %v419_v24 = vpop.f32.mrf.mxu1  ;;  %v390_v34 = vpop.f32.mrf.mxu0 }
  0xde   : > { %443 = vst [vmem:[%s1774_s23 + $0x50] sm:$0x1] %v428_v22  ;;  %v420_v25 = vadd.f32 %v1369_v12, %v419_v24  ;;  %v391_v39 = vadd.f32 %v1369_v12, %v390_v34 }
  0xdf   : > { %v1481_v27 = vpop.f32.mrf.mxu1 }
  0xe1   : > { %v422_v30 = vpop.f32.mrf.mxu1 }
  0xe2   : > { %v423_v31 = vadd.f32 %v1369_v12, %v422_v30 }
  0xe3   : > { %v1486_v33 = vpop.f32.mrf.mxu1 }
  0xe4   : > { %v647_v35 = vadd.f32 %v1486_v33, %v396_v28 }
  0xe5   : > { %v599_v37 = vpop.f32.mrf.mxu1  ;;  %v454_v51 = vld [vmem:[%s1774_s23 + $0x50] sm:$0x1] }
  0xe6   : > { %v645_v38 = vadd.f32 %v599_v37, %v388_v32 }
  0xe7   : > { %v1487_v40 = vpop.f32.mrf.mxu1 }
  0xe8   : > { %v648_v41 = vadd.f32 %v1487_v40, %v399_v36 }
  0xe9   : > { %v602_v42 = vpop.f32.mrf.mxu1 }
  0xea   : > { %v646_v43 = vadd.f32 %v602_v42, %v391_v39 }
  0xeb   : > { %v1490_v44 = vpop.f32.mrf.mxu1 }
  0xec   : > { %v651_v45 = vadd.f32 %v1490_v44, %v412_v14 }
  0xed   : > { %v615_v46 = vpop.f32.mrf.mxu1 }
  0xee   : > { %v649_v47 = vadd.f32 %v615_v46, %v404_v16 }
  0xef   : > { %v1491_v48 = vpop.f32.mrf.mxu1 }
  0xf0   : > { %v652_v49 = vadd.f32 %v1491_v48, %v415_v18 }
  0xf1   : > { %v618_v50 = vpop.f32.mrf.mxu1 }
  0xf2   : > { %v650_v52 = vadd.f32 %v618_v50, %v407_v20 }
  0xf3   : > { %v1494_v53 = vpop.f32.mrf.mxu1 }
  0xf4   : > { %v655_v54 = vadd.f32 %v1494_v53, %v454_v51 }
  0xf5   : > { %v631_v55 = vpop.f32.mrf.mxu1 }
  0xf6   : > { %666 = vst [vmem:[%s1774_s23 + $0x50] sm:$0x1] %v655_v54  ;;  %v1779_v56 = vadd.f32 %v631_v55, %v420_v25 }
  0xf7   : > { %v1495_v57 = vpop.f32.mrf.mxu1 }
  0xf9   : > { %v634_v58 = vpop.f32.mrf.mxu1 }
  0xfa   : > { %v1781_v59 = vadd.f32 %v634_v58, %v423_v31 }
  0xfb   : > { %v1514_v60 = vpop.f32.mrf.mxu1 }
  0xfd   : > { %v1053_v61 = vpop.f32.mrf.mxu1  ;;  %v677_v15 = vld [vmem:[%s1774_s23 + $0x50] sm:$0x1] }
  0xff   : > { %v1515_v62 = vpop.f32.mrf.mxu1 }
 0x101   : > { %v1056_v63 = vpop.f32.mrf.mxu1 }
 0x103   : > { %v1518_v0 = vpop.f32.mrf.mxu1 }
 0x105   : > { %v1069_v1 = vpop.f32.mrf.mxu1 }
 0x107   : > { %v1519_v2 = vpop.f32.mrf.mxu1 }
 0x109   : > { %v1072_v3 = vpop.f32.mrf.mxu1 }
 0x10b   : > { %v1522_v4 = vpop.f32.mrf.mxu1 }
 0x10d   : > { %v1783_v5 = vpop.f32.mrf.mxu1 }
 0x10f   : > { %v1523_v6 = vpop.f32.mrf.mxu1 }
 0x14e   : > { %v1500_v7 = vpop.f32.mrf.mxu0 }
 0x14f   : > { %v879_v19 = vadd.f32 %v1500_v7, %v647_v35 }
 0x150   : > { %v831_v8 = vpop.f32.mrf.mxu0 }
 0x151   : > { %v877_v21 = vadd.f32 %v831_v8, %v645_v38  ;;  %v1101_v24 = vadd.f32 %v1514_v60, %v879_v19 }
 0x152   : > { %v1501_v9 = vpop.f32.mrf.mxu0 }
 0x153   : > { %v880_v23 = vadd.f32 %v1501_v9, %v648_v41  ;;  %v1099_v27 = vadd.f32 %v1053_v61, %v877_v21 }
 0x154   : > { %v834_v10 = vpop.f32.mrf.mxu0 }
 0x155   : > { %v878_v26 = vadd.f32 %v834_v10, %v646_v43  ;;  %v1102_v32 = vadd.f32 %v1515_v62, %v880_v23 }
 0x156   : > { %v1504_v11 = vpop.f32.mrf.mxu0 }
 0x157   : > { %v883_v31 = vadd.f32 %v1504_v11, %v651_v45  ;;  %v1100_v37 = vadd.f32 %v1056_v63, %v878_v26  ;;  %v1088_v63 = vpop.f32.mrf.mxu1 }
 0x158   : > { %v847_v12 = vpop.f32.mrf.mxu0 }
 0x159   : > { %v881_v36 = vadd.f32 %v847_v12, %v649_v47  ;;  %v1105_v41 = vadd.f32 %v1518_v0, %v883_v31 }
 0x15a   : > { %v1505_v13 = vpop.f32.mrf.mxu0 }
 0x15b   : > { %v884_v40 = vadd.f32 %v1505_v13, %v652_v49  ;;  %v1103_v45 = vadd.f32 %v1069_v1, %v881_v36 }
 0x15c   : > { %v850_v14 = vpop.f32.mrf.mxu0 }
 0x15d   : > { %v882_v44 = vadd.f32 %v850_v14, %v650_v52  ;;  %v1106_v47 = vadd.f32 %v1519_v2, %v884_v40 }
 0x15e   : > { %v1508_v16 = vpop.f32.mrf.mxu0 }
 0x15f   : > { %v887_v17 = vadd.f32 %v1508_v16, %v677_v15  ;;  %v1104_v53 = vadd.f32 %v1072_v3, %v882_v44 }
 0x160   : > { %v863_v18 = vpop.f32.mrf.mxu0 }
 0x161   : > { %898 = vst [vmem:[%s1774_s23 + $0x50] sm:$0x1] %v887_v17  ;;  %v885_v49 = vadd.f32 %v863_v18, %v1779_v56 }
 0x162   : > { %v1509_v20 = vpop.f32.mrf.mxu0 }
 0x163   : > { %v1107_v61 = vadd.f32 %v1783_v5, %v885_v49 }
 0x164   : > { %v866_v22 = vpop.f32.mrf.mxu0 }
 0x165   : > { %v886_v60 = vadd.f32 %v866_v22, %v1781_v59 }
 0x166   : > { %v1528_v25 = vpop.f32.mrf.mxu0 }
 0x167   : > { %v1287_v28 = vadd.f32 %v1528_v25, %v1101_v24  ;;  %v1108_v2 = vadd.f32 %v1088_v63, %v886_v60 }
 0x168   : > { %v909_v29 = vld [vmem:[%s1774_s23 + $0x50] sm:$0x1]  ;;  %v1239_v30 = vpop.f32.mrf.mxu0 }
 0x169   : > { %v1109_v33 = vadd.f32 %v1522_v4, %v909_v29  ;;  %1298 = vst [vmem:[%s1774_s23 + $0x10] sm:$0xff] %v1287_v28  ;;  %v1285_v34 = vadd.f32 %v1239_v30, %v1099_v27 }
 0x16a   : > { %v1529_v35 = vpop.f32.mrf.mxu0 }
 0x16b   : > { %1120 = vst [vmem:[%s1774_s23 + $0x50] sm:$0x1] %v1109_v33  ;;  %1296 = vst [vmem:[%s1774_s23] sm:$0xff] %v1285_v34  ;;  %v1288_v38 = vadd.f32 %v1529_v35, %v1102_v32 }
 0x16c   : > { %v1242_v39 = vpop.f32.mrf.mxu0 }
 0x16d   : > { %1299 = vst [vmem:[%s1774_s23 + $0x18] sm:$0xff] %v1288_v38  ;;  %v1286_v42 = vadd.f32 %v1242_v39, %v1100_v37 }
 0x16e   : > { %v1532_v43 = vpop.f32.mrf.mxu0 }
 0x16f   : > { %1297 = vst [vmem:[%s1774_s23 + $0x8] sm:$0xff] %v1286_v42  ;;  %v1291_v46 = vadd.f32 %v1532_v43, %v1105_v41 }
 0x170   : > { %v1255_v48 = vpop.f32.mrf.mxu0 }
 0x171   : > { %1302 = vst [vmem:[%s1774_s23 + $0x30] sm:$0xff] %v1291_v46  ;;  %v1289_v50 = vadd.f32 %v1255_v48, %v1103_v45 }
 0x172   : > { %v1533_v51 = vpop.f32.mrf.mxu0  ;;  %v1131_v57 = vld [vmem:[%s1774_s23 + $0x50] sm:$0x1] }
 0x173   : > { %1300 = vst [vmem:[%s1774_s23 + $0x20] sm:$0xff] %v1289_v50  ;;  %v1292_v54 = vadd.f32 %v1533_v51, %v1106_v47 }
 0x174   : > { %v1258_v55 = vpop.f32.mrf.mxu0 }
 0x175   : > { %1303 = vst [vmem:[%s1774_s23 + $0x38] sm:$0xff] %v1292_v54  ;;  %v1290_v52 = vadd.f32 %v1258_v55, %v1104_v53 }
 0x176   : > { %v1536_v58 = vpop.f32.mrf.mxu0 }
 0x177   : > { %1301 = vst [vmem:[%s1774_s23 + $0x28] sm:$0xff] %v1290_v52  ;;  %v1295_v62 = vadd.f32 %v1536_v58, %v1131_v57 }
 0x178   : > { %v1271_v0 = vpop.f32.mrf.mxu0 }
 0x179   : > { %1306 = vst [vmem:[%s1774_s23 + $0x50] sm:$0x1] %v1295_v62  ;;  %v1293_v56 = vadd.f32 %v1271_v0, %v1107_v61 }
 0x17a   : > { %v1537_v1 = vpop.f32.mrf.mxu0 }
 0x17b   : > { %1304 = vst [vmem:[%s1774_s23 + $0x40] sm:$0xff] %v1293_v56 }
 0x17c   : > { %v1274_v3 = vpop.f32.mrf.mxu0 }
 0x17d   : > { %v1294_v4 = vadd.f32 %v1274_v3, %v1108_v2 }
 0x17f   : > { %1305 = vst [vmem:[%s1774_s23 + $0x48] sm:$0xff] %v1294_v4 }
 0x180 PF: > { %s17_s24 = sadd.s32 1, %s1592_s24  }
 0x181   : > { %p14_p4 = scmp.ge.s32.totalorder %s17_s24, 4  }
 0x183   :  { %16 = sbr.rel (!%p14_p4) target bundleno = 1 (0x1), region = 78 }

</bundles_post_ra>
